<compile_context>
chip_gen: v6e
topology: v6e:2x2x1
jax: 0.10.0
libtpu: 0.0.40
codegen_flags: <defaults>
</compile_context>

<pallas_src>
import functools

import jax
import jax.numpy as jnp
from jax.experimental import pallas as pl
from jax.experimental.pallas import tpu as pltpu


def _round_up(x, m):
    return ((x + m - 1) // m) * m


def _apply_activation(h, activation):
    if activation is None:
        return h
    if activation == "tanh":
        return jnp.tanh(h)
    if activation == "relu":
        return jnp.maximum(h, 0.0)
    if activation == "sigmoid":
        return jax.nn.sigmoid(h)
    if activation == "gelu":
        # PyTorch nn.GELU defaults to the exact erf form -> approximate=False.
        return jax.nn.gelu(h, approximate=False)
    raise ValueError(f"unsupported activation: {activation}")


# ----------------------------- kernels ------------------------------------ #
def _kernel_multi_k(x_ref, w_ref, b_ref, o_ref, acc_ref, *, activation,
                    compute_dtype):
    # x_ref: (tm, tk), w_ref: (tk, tn) in the *input* dtype (cast here),
    # b_ref: (1, tn) f32, o_ref: (tm, tn), acc_ref: (tm, tn) f32 scratch.
    k = pl.program_id(2)

    @pl.when(k == 0)
    def _():
        acc_ref[...] = jnp.zeros_like(acc_ref)

    acc_ref[...] += jnp.dot(
        x_ref[...].astype(compute_dtype),
        w_ref[...].astype(compute_dtype),
        preferred_element_type=jnp.float32,
    )

    @pl.when(k == pl.num_programs(2) - 1)
    def _():
        h = acc_ref[...] + b_ref[...]          # broadcast (1, tn) over rows
        h = _apply_activation(h, activation)
        o_ref[...] = h.astype(o_ref.dtype)


def _kernel_single_k(x_ref, w_ref, b_ref, o_ref, *, activation, compute_dtype):
    # Whole K fits in one tile: no accumulator scratch / init / RMW needed.
    h = jnp.dot(
        x_ref[...].astype(compute_dtype),
        w_ref[...].astype(compute_dtype),
        preferred_element_type=jnp.float32,
    )
    h = h + b_ref[...]
    h = _apply_activation(h, activation)
    o_ref[...] = h.astype(o_ref.dtype)


# --------------------------- tiling helpers -------------------------------- #
def _vmem_budget_bytes():
    # ~75% of physical VMEM: ~96 MiB (v5e/v6e, 128 MiB) / ~48 MiB (v7x, 64 MiB).
    try:
        cap = pltpu.get_tpu_info().vmem_capacity_bytes
    except Exception:
        cap = 64 * 1024 * 1024          # conservative fallback (v7x-sized)
    return int(min((cap * 3) // 4, 100 * 1024 * 1024))


def _fit_max_tiles(max_tm, max_tn, max_tk, xb, wb, ob, budget):
    """Shrink tile caps until the (double-buffered) working set fits."""
    def usage(tm, tn, tk):
        return (2 * tm * tk * xb      # x blocks (double-buffered)
                + 2 * tk * tn * wb    # W blocks
                + 2 * tm * tn * ob    # out blocks
                + tm * tn * 4         # f32 accumulator
                + 2 * tn * 4)         # bias blocks

    while usage(max_tm, max_tn, max_tk) > budget and max_tk > 128:
        max_tk //= 2
    while usage(max_tm, max_tn, max_tk) > budget and max_tn > 128:
        max_tn //= 2
    while usage(max_tm, max_tn, max_tk) > budget and max_tm > 16:
        max_tm //= 2
    return max_tm, max_tn, max_tk


def _choose_tile(dim, max_tile, align):
    """Return (tile, padded_dim); prefers no padding."""
    if dim <= max_tile:
        return dim, dim                  # one full-dim block -> always legal, no pad
    dp = _round_up(dim, align)
    t = max((max_tile // align) * align, align)
    cand = t
    while cand >= align:                 # prefer a tile that divides the aligned dim
        if dp % cand == 0:
            return cand, dp
        cand -= align
    return t, _round_up(dim, t)          # fall back to max tile + padding


# ----------------------------- wrapper ------------------------------------- #
def nonlinear_forward(
    x,
    w_t,
    b=None,
    activation=None,
    *,
    tm=512,
    tn=1024,
    tk=1024,
    compute_dtype=jnp.bfloat16,
):
    """y = activation(x @ w_t + b).

    x:   (M, K)
    w_t: (K, N)   (transpose of PyTorch's (N, K) Linear weight)
    b:   (N,) or None
    """
    M, K = x.shape
    Kw, N = w_t.shape
    assert K == Kw, (K, Kw)
    out_dtype = x.dtype

    xb = jnp.dtype(x.dtype).itemsize
    wb = jnp.dtype(w_t.dtype).itemsize
    ob = jnp.dtype(out_dtype).itemsize

    # --- per-generation VMEM budget + tile caps -----------------------------
    budget = _vmem_budget_bytes()
    tm, tn, tk = _fit_max_tiles(tm, tn, tk, xb, wb, ob, budget)

    # --- tile selection (prefer full-dim tiles / exact divisors -> no pad) --
    align_m = 8 if xb >= 4 else (16 if xb == 2 else 32)   # sublane packing
    tm, Mp = _choose_tile(M, tm, align_m)
    tn, Np = _choose_tile(N, tn, 128)
    tk, Kp = _choose_tile(K, tk, 128)

    # Megacore (v7x): keep >= 2 blocks on a parallel axis when it's free.
    if Mp // tm == 1 and Np // tn == 1 and N >= 256 and N % 256 == 0:
        tn = N // 2

    # --- bias (tiny; kept f32) ----------------------------------------------
    if b is None:
        b2 = jnp.zeros((1, Np), jnp.float32)
    else:
        b2 = b.astype(jnp.float32).reshape(1, N)
        if Np != N:
            b2 = jnp.pad(b2, ((0, 0), (0, Np - N)))

    # --- padding only when strictly required --------------------------------
    # K-tail zeros are correctness-critical for the reduction; M/N padding
    # only produces extra rows/cols that are sliced away below.
    xp = x
    wp = w_t
    if (Mp, Kp) != (M, K):
        xp = jnp.pad(x, ((0, Mp - M), (0, Kp - K)))
    if (Kp, Np) != (K, N):
        wp = jnp.pad(w_t, ((0, Kp - K), (0, Np - N)))

    n_k = Kp // tk
    transcendentals = M * N if activation in ("tanh", "sigmoid", "gelu") else 0
    cost = pl.CostEstimate(
        flops=2 * M * N * K,
        transcendentals=transcendentals,
        bytes_accessed=M * K * xb + K * N * wb + N * 4 + M * N * ob,
    )

    if n_k > 1:
        kernel = functools.partial(
            _kernel_multi_k, activation=activation, compute_dtype=compute_dtype)
        grid = (Np // tn, Mp // tm, n_k)          # (j over N, i over M, k last)
        in_specs = [
            pl.BlockSpec((tm, tk), lambda j, i, k: (i, k)),   # x tile
            pl.BlockSpec((tk, tn), lambda j, i, k: (k, j)),   # W tile
            pl.BlockSpec((1, tn), lambda j, i, k: (0, j)),    # bias tile
        ]
        out_spec = pl.BlockSpec((tm, tn), lambda j, i, k: (i, j))
        scratch = [pltpu.VMEM((tm, tn), jnp.float32)]
        semantics = ("parallel", "parallel", "arbitrary")
    else:
        kernel = functools.partial(
            _kernel_single_k, activation=activation, compute_dtype=compute_dtype)
        grid = (Np // tn, Mp // tm)
        in_specs = [
            pl.BlockSpec((tm, tk), lambda j, i: (i, 0)),
            pl.BlockSpec((tk, tn), lambda j, i: (0, j)),
            pl.BlockSpec((1, tn), lambda j, i: (0, j)),
        ]
        out_spec = pl.BlockSpec((tm, tn), lambda j, i: (i, j))
        scratch = []
        semantics = ("parallel", "parallel")

    out_padded = pl.pallas_call(
        kernel,
        out_shape=jax.ShapeDtypeStruct((Mp, Np), out_dtype),
        grid_spec=pltpu.PrefetchScalarGridSpec(
            num_scalar_prefetch=0,
            grid=grid,
            in_specs=in_specs,
            out_specs=out_spec,
            scratch_shapes=scratch,
        ),
        compiler_params=pltpu.CompilerParams(
            dimension_semantics=semantics,
            vmem_limit_bytes=budget,
        ),
        cost_estimate=cost,
    )(xp, wp, b2)

    if (Mp, Np) != (M, N):
        out_padded = out_padded[:M, :N]
    return out_padded


def reference_forward(x, w_t, b, activation=None, compute_dtype=jnp.bfloat16):
    # Match the kernel's numerics: bf16 matmul inputs, f32 accumulation.
    h = jnp.dot(
        x.astype(compute_dtype),
        w_t.astype(compute_dtype),
        preferred_element_type=jnp.float32,
    )
    if b is not None:
        h = h + b.astype(jnp.float32)
    return _apply_activation(h, activation)


if __name__ == "__main__":
    # NonLinear(input_size=32, output_size=32, bias=True, activation=tanh)
    # TODO(synk): bayes=True (BayesLinear) branch not implemented; only the
    # nn.Linear path of NonLinear is covered.
    input_size = 32
    output_size = 32
    batch = 8

    key = jax.random.PRNGKey(0)
    kx, kw, kb = jax.random.split(key, 3)

    x = jax.random.normal(kx, (batch, input_size), dtype=jnp.float32)

    # Deterministic init mimicking nn.Linear: U(-1/sqrt(fan_in), 1/sqrt(fan_in))
    bound = 1.0 / jnp.sqrt(jnp.float32(input_size))
    w = jax.random.uniform(kw, (output_size, input_size),
                           minval=-bound, maxval=bound, dtype=jnp.float32)
    b = jax.random.uniform(kb, (output_size,),
                           minval=-bound, maxval=bound, dtype=jnp.float32)
    w_t = w.T  # (in_features, out_features) for the kernel layout

    # activation = tanh path
    y = jax.block_until_ready(nonlinear_forward(x, w_t, b, activation="tanh"))
    y_ref = reference_forward(x, w_t, b, activation="tanh")
    assert y.shape == (batch, output_size)
    assert jnp.allclose(y, y_ref, atol=1e-3, rtol=1e-3), "tanh mismatch vs reference"

    # activation = None path (pure Linear), like NonLinear's default.
    y_lin = jax.block_until_ready(nonlinear_forward(x, w_t, b, activation=None))
    y_lin_ref = reference_forward(x, w_t, b, activation=None)
    assert jnp.allclose(y_lin, y_lin_ref, atol=1e-3, rtol=1e-3), "linear mismatch"

    # A larger, multi-K-tile shape to exercise the accumulator path.
    M2, K2, N2 = 256, 2048, 512
    k2x, k2w, k2b = jax.random.split(jax.random.PRNGKey(1), 3)
    x2 = jax.random.normal(k2x, (M2, K2), dtype=jnp.float32)
    w2 = jax.random.normal(k2w, (K2, N2), dtype=jnp.float32) * 0.02
    b2 = jax.random.normal(k2b, (N2,), dtype=jnp.float32) * 0.02
    y2 = jax.block_until_ready(
        nonlinear_forward(x2, w2, b2, activation="relu", tk=1024))
    y2_ref = reference_forward(x2, w2, b2, activation="relu")
    assert jnp.allclose(y2, y2_ref, atol=2e-2, rtol=2e-2), "multi-K mismatch"

    print("KERNEL_OK")
</pallas_src>

<mosaic_0001>
module attributes {stable_mosaic.version = 11 : i64} {
  func.func @_kernel_single_k(%arg0: i32, %arg1: i32, %arg2: memref<8x32xf32, #tpu.memory_space<vmem>>, %arg3: memref<32x32xf32, #tpu.memory_space<vmem>>, %arg4: memref<1x32xf32, #tpu.memory_space<vmem>>, %arg5: memref<8x32xf32, #tpu.memory_space<vmem>>) attributes {dimension_semantics = [#tpu.dimension_semantics<parallel>, #tpu.dimension_semantics<parallel>], iteration_bounds = array<i64: 1, 1>, scalar_prefetch = 0 : i64, scratch_operands = 0 : i64, tpu.core_type = #tpu.core_type<tc>, window_params = [{transform_indices = @transform_0, window_bounds = array<i64: 8, 32>}, {transform_indices = @transform_1, window_bounds = array<i64: 32, 32>}, {transform_indices = @transform_2, window_bounds = array<i64: 1, 32>}, {transform_indices = @transform_3, window_bounds = array<i64: 8, 32>}]} {
    %c0 = arith.constant 0 : index
    %c0_0 = arith.constant 0 : index
    %0 = vector.load %arg2[%c0, %c0_0] : memref<8x32xf32, #tpu.memory_space<vmem>>, vector<8x32xf32>
    %1 = arith.truncf %0 : vector<8x32xf32> to vector<8x32xbf16>
    %c0_1 = arith.constant 0 : index
    %c0_2 = arith.constant 0 : index
    %2 = vector.load %arg3[%c0_1, %c0_2] : memref<32x32xf32, #tpu.memory_space<vmem>>, vector<32x32xf32>
    %3 = arith.truncf %2 : vector<32x32xf32> to vector<32x32xbf16>
    %cst = arith.constant dense<0.000000e+00> : vector<8x32xf32>
    %4 = tpu.matmul %1, %3, %cst {dimension_numbers = #tpu.dot_dimension_numbers<[1], [0], [0], [1], [0, 0, 1, 1], [], []>} : vector<8x32xbf16>, vector<32x32xbf16>, vector<8x32xf32> -> vector<8x32xf32>
    %c0_3 = arith.constant 0 : index
    %c0_4 = arith.constant 0 : index
    %5 = vector.load %arg4[%c0_3, %c0_4] : memref<1x32xf32, #tpu.memory_space<vmem>>, vector<1x32xf32>
    %6 = vector.broadcast %5 : vector<1x32xf32> to vector<8x32xf32>
    %7 = arith.addf %4, %6 : vector<8x32xf32>
    %8 = math.tanh %7 : vector<8x32xf32>
    %c0_5 = arith.constant 0 : index
    %c0_6 = arith.constant 0 : index
    %9 = vector.load %arg5[%c0_5, %c0_6] : memref<8x32xf32, #tpu.memory_space<vmem>>, vector<8x32xf32>
    tpu.vector_store %arg5[%c0_5, %c0_6], %8 {strides = array<i32>} : memref<8x32xf32, #tpu.memory_space<vmem>>, vector<8x32xf32>,
    return
  }
  func.func @transform_0(%arg0: i32, %arg1: i32) -> (i32, i32) {
    %c0_i32 = arith.constant 0 : i32
    %c0_i32_0 = arith.constant 0 : i32
    return %arg1, %c0_i32 : i32, i32
  }
  func.func @transform_1(%arg0: i32, %arg1: i32) -> (i32, i32) {
    %c0_i32 = arith.constant 0 : i32
    %c0_i32_0 = arith.constant 0 : i32
    return %c0_i32, %arg0 : i32, i32
  }
  func.func @transform_2(%arg0: i32, %arg1: i32) -> (i32, i32) {
    %c0_i32 = arith.constant 0 : i32
    %c0_i32_0 = arith.constant 0 : i32
    return %c0_i32, %arg0 : i32, i32
  }
  func.func @transform_3(%arg0: i32, %arg1: i32) -> (i32, i32) {
    %c0_i32 = arith.constant 0 : i32
    return %arg1, %arg0 : i32, i32
  }
}

</mosaic_0001>

<bundles_post_ra>
// kernel: tpu_custom_call.1
= control target key start
LH: loop header
LB: loop body
LE: loop exit
PB: predicated region body
PF: predicated region fallthrough
CT: control target
= control target key end

     0   :  { %8 = vsyncpa [#allocation3], 0  ;;  %s246_s0 = inlined_call_operand.hbm [shape: f32[8,32], index: 0, kind: input, shape index: {}]   ;;  %s247_s1 = inlined_call_operand.hbm [shape: f32[32,32], index: 1, kind: input, shape index: {}]   ;;  %s248_s2 = inlined_call_operand.vmem [shape: f32[1,32], index: 2, kind: input, shape index: {}]   ;;  %s249_s3 = inlined_call_operand.hbm [shape: f32[8,32], index: 3, kind: output, shape index: {}]  }
   0x1   :  { %9 = vsyncpa [#allocation6], 0 }
   0x2   :  { %10 = vsyncpa [#allocation4], 0  ;;  %s207_s12 = smov [#allocation2]   ;;  %s208_s14 = smov [#allocation5]  }
   0x3   :  { %s17_s13 = sshll.u32 %s207_s12, 4  ;;  %s26_s15 = sshll.u32 %s208_s14, 4  ;;  %s18_s13 = int_to_ptr.vmem [resolvable:$true] %s17_s13  ;;  %s27_s15 = int_to_ptr.vmem [resolvable:$true] %s26_s15 }
   0x4   :  { %s149_s16 = scalar_lea.vmem %s18_s13, 128  ;;  %p154_p1 = scmp.lt.s32.totalorder %s18_s13, %s18_s13 }
   0x5   :  { %p150_p0 = scmp.ne.s32.totalorder %s18_s13, %s149_s16  ;;  %p155_p2 = scmp.lt.s32.totalorder %s149_s16, %s149_s16 }
   0x7   :  { %p156_p3 = por %p155_p2, %p154_p1 }
   0x9   :  { %p157_p4 = pnand %p156_p3, %p150_p0 }
   0xb   :  { %160 = shalt.err (!%p157_p4)
}
   0xc   :  { %20 = dma.hbm_to_vmem [thread:$0]  %s246_s0, 128, %s18_s13, [#allocation3]  }
   0xd   :  { %s169_s19 = scalar_lea.vmem %s27_s15, 512  ;;  %p174_p6 = scmp.lt.s32.totalorder %s27_s15, %s27_s15 }
   0xe   :  { %p170_p5 = scmp.ne.s32.totalorder %s27_s15, %s169_s19  ;;  %p175_p7 = scmp.lt.s32.totalorder %s169_s19, %s169_s19 }
  0x10   :  { %p176_p8 = por %p175_p7, %p174_p6 }
  0x12   :  { %p177_p9 = pnand %p176_p8, %p170_p5 }
  0x14   :  { %180 = shalt.err (!%p177_p9)
}
  0x15   :  { %s209_s20 = smov 128   ;;  %s210_s21 = smov 8  }
  0x16   :  { %32 = dma.hbm_to_vmem [thread:$0]  %s247_s1, 512, %s27_s15, [#allocation6], %s209_s20, %s209_s20, %s210_s21  }
  0x17   :  { %201 = dma.done.wait [#allocation3], 128  }
  0x18   :  { %202 = vsyncadd [#allocation3], 4294967168 }
  0x19   :  { %203 = dma.done.wait [#allocation6], 512  }
  0x1a   :  { %204 = vsyncadd [#allocation6], 4294966784  ;;  %v211_v0 = vmov 0.0   ;;  %vm212_vm0 = vmmov 0   ;;  %v46_v1 = vld [vmem:[#allocation5 + $0x10] sm:$0xff]  ;;  %v47_v2 = vld [vmem:[#allocation5 + $0x18] sm:$0xff] }
  0x1b   :  { %124 = vmatprep.subr.bf16.mxu0 %v211_v0  ;;  %128 = vmatprep.mubr.msk.bf16.mxu0 %vm212_vm0, %v211_v0  ;;  %v44_v3 = vld [vmem:[#allocation5] sm:$0xff]  ;;  %v49_v4 = vpack.c.bf16 %v47_v2, %v46_v1  ;;  %v45_v5 = vld [vmem:[#allocation5 + $0x8] sm:$0xff]  ;;  %v42_v7 = vld [vmem:[#allocation2] sm:$0xff]  ;;  %vm57_vm1 = vcmask 261120   ;;  %s213_s24 = smov [#allocation7]  }
  0x1c   :  { %v48_v6 = vpack.c.bf16 %v45_v5, %v44_v3  ;;  %v43_v8 = vpack.c.bf16 %v42_v7, %v42_v7  ;;  %v119_v9 = vld [vmem:[%s248_s2] ss:$0 sm:$0xff]  ;;  %s109_s25 = sshll.u32 %s213_s24, 4  ;;  %s110_s25 = int_to_ptr.vmem [resolvable:$true] %s109_s25 }
  0x1d   :  { %125 = vmatpush3.bf16.msra.mxu0 %v49_v4  ;;  %s181_s26 = scalar_lea.vmem %s110_s25, 128  ;;  %p186_p11 = scmp.lt.s32.totalorder %s110_s25, %s110_s25 }
  0x1e   :  { %126 = vmatprep.subr.bf16.mxu0 %v211_v0  ;;  %p182_p10 = scmp.ne.s32.totalorder %s110_s25, %s181_s26  ;;  %p187_p12 = scmp.lt.s32.totalorder %s181_s26, %s181_s26 }
  0x20   :  { %p188_p13 = por %p187_p12, %p186_p11 }
  0x21   :  { %127 = vmatpush3.bf16.msra.mxu0 %v48_v6 }
  0x22   :  { %p189_p0 = pnand %p188_p13, %p182_p10 }
  0x24   :  { %129 = vmatmul.mubr.msk.bf16.vlgmr.msra.gmra.mxu0 %vm57_vm1, %v43_v8 }
  0xe4   :  { %v95_v10 = vpop.f32.mrf.mxu0 }
  0xe5   :  { %v96_v11 = vadd.f32 %v119_v9, %v95_v10 }
  0xe6   :  { %v130_v12 = vpop.f32.mrf.mxu0 }
  0xe7   :  { %139 = vtanh.f32 %v96_v11 }
  0xe8   :  { %v98_v13 = vpop.f32.mrf.mxu0 }
  0xea   :  { %v131_v14 = vpop.f32.mrf.mxu0 }
  0xf4   :  { %v140_v15 = vpop.eup %139 }
  0xf5   :  { %102 = vst.msk [vmem:[#allocation7] sm:$0xff] %vm57_vm1, %v140_v15 }
  0xf6   :  { %192 = shalt.err (!%p189_p0)
}
  0xf7   :  { %112 = dma.vmem_to_hbm [thread:$0]  %s110_s25, 128, %s249_s3, [#allocation4]  }
  0xf8   :  { %205 = dma.done.wait [#allocation4], 128  }
  0xf9   :  { %206 = vsyncadd [#allocation4], 4294967168 }
  0xfa   :  { %116 = vsyncpa [#allocation3], 1 }
  0xfb   :  { %117 = vsyncpa [#allocation6], 1 }
  0xfc   :  { %118 = vsyncpa [#allocation4], 1 }

</bundles_post_ra>
